<compile_context>
chip_gen: v7x
topology: tpu7x:2x2x1
jax: 0.10.0
libtpu: 0.0.40
codegen_flags: <defaults>
</compile_context>

<pallas_src>
import functools
import math

import jax
import jax.numpy as jnp
from jax.experimental import pallas as pl
from jax.experimental.pallas import tpu as pltpu


def _round_up(a, b):
    return ((a + b - 1) // b) * b


# ---------------------------------------------------------------------------
# In-kernel helpers
# ---------------------------------------------------------------------------
def _erf_approx(x):
    # Abramowitz–Stegun 7.1.26 polynomial (max abs err ~1.5e-7); exp -> EUP.
    # TODO(synk): not bit-exact with torch's erf-based GELU, but well inside
    # f32 tolerance for this module.
    ax = jnp.abs(x)
    t = 1.0 / (1.0 + 0.3275911 * ax)
    poly = t * (0.254829592
                + t * (-0.284496736
                       + t * (1.421413741
                              + t * (-1.453152027 + t * 1.061405429))))
    y = 1.0 - poly * jnp.exp(-ax * ax)
    return jnp.where(x >= 0.0, y, -y)


def _gelu_exact(x):
    return 0.5 * x * (1.0 + _erf_approx(x * (1.0 / math.sqrt(2.0))))


# ---------------------------------------------------------------------------
# Kernel 1: conv (MXU) + per-tile per-channel partial stats.
#           NO activation write (stats only) -> "parallel" grid axis.
# ---------------------------------------------------------------------------
def _conv_stats_kernel(p_ref, w_ref, b_ref, s_ref, sq_ref, *, n_real, time_tile):
    # (OC, K) @ (K, TT) on the MXU, + bias; zero out columns past the real data
    # so they contribute exactly 0 to the GroupNorm moments (like torch's pad).
    y = jnp.dot(w_ref[...], p_ref[...], preferred_element_type=jnp.float32)
    y = y + b_ref[...]
    col = (pl.program_id(0) * time_tile
           + jax.lax.broadcasted_iota(jnp.int32, (1, time_tile), 1))
    y = jnp.where(col < n_real, y, 0.0)
    s_ref[0] = jnp.sum(y, axis=1, keepdims=True)        # (OC, 1)
    sq_ref[0] = jnp.sum(y * y, axis=1, keepdims=True)    # (OC, 1)


# ---------------------------------------------------------------------------
# Kernel 2: conv with GroupNorm scale folded into the weights + per-channel
#           shift + exact GELU, written directly in (OC, time) layout.
# ---------------------------------------------------------------------------
def _conv_norm_gelu_kernel(p_ref, w_ref, shift_ref, o_ref):
    y = jnp.dot(w_ref[...], p_ref[...], preferred_element_type=jnp.float32)
    o_ref[...] = _gelu_exact(y + shift_ref[...])


# ---------------------------------------------------------------------------
# Wrapper (glue: im2col layout, parameter folding, tiny stats epilogue)
# ---------------------------------------------------------------------------
def wavlm_groupnorm_conv_npu(x, conv_w, conv_b, gamma, beta, *,
                             stride=5, slice_size=16000, eps=1e-5,
                             time_tile=1024):
    out_channels, in_channels, kernel = conv_w.shape
    assert in_channels == 1
    assert kernel % stride == 0
    kw2 = kernel // stride                      # conv2d kernel width
    half_k = kw2 // 2

    seq_len = x.shape[-1]
    assert seq_len % stride == 0
    w_len = seq_len // stride                   # width after (stride, W) reshape
    num_slices = w_len // slice_size
    assert num_slices >= 1, "sequence shorter than one slice"

    # Mirror torch's "Should only have 1 elem missing" check.
    last_begin = (num_slices - 1) * slice_size
    last_end = min(last_begin + slice_size + half_k, w_len)
    num_pad = slice_size - (last_end - last_begin - (kw2 - 1))
    if num_pad > 1:
        raise ValueError("Should only have 1 elem missing")

    total = num_slices * slice_size             # positions seen by GroupNorm
    conv_len = w_len - kw2 + 1                  # valid conv1d outputs
    n_real = min(conv_len, total)               # real (non-zero-pad) positions
    n_out = total - 1                           # positions in the final output

    assert time_tile % 128 == 0
    tt = min(time_tile, _round_up(max(n_real, n_out, 1), 128))
    nt_stats = pl.cdiv(n_real, tt)              # tiles needed for the moments
    nt_out = pl.cdiv(n_out, tt)                 # tiles needed for the output
    t_pad = max(nt_stats, nt_out) * tt

    f32 = jnp.float32
    xf = x.reshape(-1).astype(f32)
    frames_t = xf.reshape(w_len, stride).T                       # (stride, W)
    # im2col in time-on-lanes layout: patches_t[j*stride+s, w] = x[(w+j)*stride+s]
    cols = min(conv_len, t_pad)
    patches_t = jnp.concatenate(
        [frames_t[:, j:j + cols] for j in range(kw2)], axis=0)   # (K, cols)
    patches_t = jnp.pad(patches_t, ((0, 0), (0, t_pad - cols)))  # (K, t_pad)

    w_mat = conv_w.reshape(out_channels, kernel).astype(f32)     # (OC, K)
    b_col = conv_b.reshape(out_channels, 1).astype(f32)          # (OC, 1)

    # ---- pass 1: per-channel partial sum / sum-of-squares -------------------
    psum, psq = pl.pallas_call(
        functools.partial(_conv_stats_kernel, n_real=n_real, time_tile=tt),
        out_shape=(jax.ShapeDtypeStruct((nt_stats, out_channels, 1), f32),
                   jax.ShapeDtypeStruct((nt_stats, out_channels, 1), f32)),
        grid_spec=pltpu.PrefetchScalarGridSpec(
            num_scalar_prefetch=0,
            grid=(nt_stats,),
            in_specs=[
                pl.BlockSpec((kernel, tt), lambda t: (0, t)),
                pl.BlockSpec((out_channels, kernel), lambda t: (0, 0)),
                pl.BlockSpec((out_channels, 1), lambda t: (0, 0)),
            ],
            out_specs=[
                pl.BlockSpec((1, out_channels, 1), lambda t: (t, 0, 0)),
                pl.BlockSpec((1, out_channels, 1), lambda t: (t, 0, 0)),
            ]),
        compiler_params=pltpu.CompilerParams(
            dimension_semantics=("parallel",)),
    )(patches_t, w_mat, b_col)

    # ---- tiny XLA epilogue: finish moments, fold GroupNorm into conv params --
    ssum = jnp.sum(psum[:, :, 0], axis=0)                        # (OC,)
    ssq = jnp.sum(psq[:, :, 0], axis=0)
    mean = ssum * (1.0 / total)
    var = jnp.maximum(ssq * (1.0 / total) - mean * mean, 0.0)    # biased, as GN
    scale = gamma.astype(f32) * jax.lax.rsqrt(var + eps)         # (OC,)
    w_fold = w_mat * scale[:, None]                              # (OC, K)
    shift_col = ((conv_b.astype(f32) - mean) * scale
                 + beta.astype(f32)).reshape(out_channels, 1)    # (OC, 1)

    # ---- pass 2: fused conv + normalize + GELU, final (OC, time) layout ------
    y = pl.pallas_call(
        _conv_norm_gelu_kernel,
        out_shape=jax.ShapeDtypeStruct((out_channels, n_out), f32),
        grid_spec=pltpu.PrefetchScalarGridSpec(
            num_scalar_prefetch=0,
            grid=(nt_out,),
            in_specs=[
                pl.BlockSpec((kernel, tt), lambda t: (0, t)),
                pl.BlockSpec((out_channels, kernel), lambda t: (0, 0)),
                pl.BlockSpec((out_channels, 1), lambda t: (0, 0)),
            ],
            out_specs=pl.BlockSpec((out_channels, tt), lambda t: (0, t)),
        ),
        compiler_params=pltpu.CompilerParams(
            dimension_semantics=("parallel",)),
    )(patches_t, w_fold, shift_col)

    return y[None]                               # (1, OC, total-1), NCW layout


# ---------------------------------------------------------------------------
# Pure-JAX reference that mirrors the PyTorch forward structure
# ---------------------------------------------------------------------------
def reference_forward(x, conv_w, conv_b, gamma, beta, stride, slice_size,
                      eps=1e-5):
    out_channels, _, kernel = conv_w.shape
    kw2 = kernel // stride
    half_k = kw2 // 2
    seq_len = x.shape[-1]
    w_len = seq_len // stride
    x2d = x.reshape(-1).astype(jnp.float32).reshape(w_len, stride).T  # (S, W)
    # conv2d weight  w2d[oc, s, j] = w1d[oc, 0, j*stride + s]
    w2d = conv_w.astype(jnp.float32).reshape(out_channels, kw2, stride)
    w2d = jnp.transpose(w2d, (0, 2, 1))
    num_slices = w_len // slice_size
    outs = []
    for i in range(num_slices):
        begin = i * slice_size
        end = min(begin + slice_size + half_k, w_len)
        xs = x2d[:, begin:end]
        out_w = xs.shape[1] - kw2 + 1
        pat = jnp.stack([xs[:, j:j + out_w] for j in range(kw2)], axis=-1)
        co = jnp.einsum("csj,swj->cw", w2d, pat) + conv_b[:, None]
        if i == num_slices - 1:
            pad = slice_size - out_w
            if pad == 1:
                co = jnp.pad(co, ((0, 0), (0, 1)))
        outs.append(co)
    xcat = jnp.stack(outs, axis=1)                         # (OC, ns, ss)
    flat = xcat.reshape(out_channels, -1)
    mean = flat.mean(axis=1, keepdims=True)
    var = ((flat - mean) ** 2).mean(axis=1, keepdims=True)
    xn = (flat - mean) * jax.lax.rsqrt(var + eps) * gamma[:, None] + beta[:, None]
    xg = 0.5 * xn * (1.0 + jax.lax.erf(xn / math.sqrt(2.0)))
    return xg[:, :-1][None]


# ---------------------------------------------------------------------------
if __name__ == "__main__":
    key = jax.random.PRNGKey(0)
    k1, k2, k3, k4, k5 = jax.random.split(key, 5)

    OC, K, STRIDE = 64, 10, 5         # WavLM layer-0 conv: kernel 10, stride 5
    SLICE = 160                       # small stand-in for the module's 16000
    NUM_SLICES = 2
    seq_len = NUM_SLICES * SLICE * STRIDE            # 1600 samples

    x = jax.random.normal(k1, (1, 1, seq_len), jnp.float32)
    conv_w = jax.random.normal(k2, (OC, 1, K), jnp.float32) / math.sqrt(K)
    conv_b = 0.1 * jax.random.normal(k3, (OC,), jnp.float32)
    gamma = 1.0 + 0.1 * jax.random.normal(k4, (OC,), jnp.float32)
    beta = 0.1 * jax.random.normal(k5, (OC,), jnp.float32)

    # Small time tile for the tiny test so the grid / masked edge tile are
    # actually exercised; production default is time_tile=1024.
    out = wavlm_groupnorm_conv_npu(x, conv_w, conv_b, gamma, beta,
                                   stride=STRIDE, slice_size=SLICE,
                                   time_tile=128)
    out = jax.block_until_ready(out)

    ref = reference_forward(x, conv_w, conv_b, gamma, beta, STRIDE, SLICE)
    assert out.shape == ref.shape == (1, OC, NUM_SLICES * SLICE - 1), out.shape
    max_err = float(jnp.max(jnp.abs(out - ref)))
    assert jnp.allclose(out, ref, rtol=1e-3, atol=5e-4), max_err
    print("KERNEL_OK")
</pallas_src>

<mosaic_0001>
module attributes {stable_mosaic.version = 11 : i64} {
  func.func @_conv_stats_kernel(%arg0: i32, %arg1: memref<10x128xf32, #tpu.memory_space<vmem>>, %arg2: memref<64x10xf32, #tpu.memory_space<vmem>>, %arg3: memref<64x1xf32, #tpu.memory_space<vmem>>, %arg4: memref<1x64x1xf32, #tpu.memory_space<vmem>>, %arg5: memref<1x64x1xf32, #tpu.memory_space<vmem>>) attributes {dimension_semantics = [#tpu.dimension_semantics<parallel>], iteration_bounds = array<i64: 3>, scalar_prefetch = 0 : i64, scratch_operands = 0 : i64, tpu.core_type = #tpu.core_type<tc>, window_params = [{transform_indices = @transform_0, window_bounds = array<i64: 10, 128>}, {pipeline_mode = #tpu.pipeline_mode<synchronous>, transform_indices = @transform_1, window_bounds = array<i64: 64, 10>}, {pipeline_mode = #tpu.pipeline_mode<synchronous>, transform_indices = @transform_2, window_bounds = array<i64: 64, 1>}, {transform_indices = @transform_3, window_bounds = array<i64: 1, 64, 1>}, {transform_indices = @transform_4, window_bounds = array<i64: 1, 64, 1>}]} {
    %c0 = arith.constant 0 : index
    %c0_0 = arith.constant 0 : index
    %0 = vector.load %arg2[%c0, %c0_0] : memref<64x10xf32, #tpu.memory_space<vmem>>, vector<64x10xf32>
    %c0_1 = arith.constant 0 : index
    %c0_2 = arith.constant 0 : index
    %1 = vector.load %arg1[%c0_1, %c0_2] : memref<10x128xf32, #tpu.memory_space<vmem>>, vector<10x128xf32>
    %cst = arith.constant dense<0.000000e+00> : vector<64x128xf32>
    %2 = tpu.matmul %0, %1, %cst {dimension_numbers = #tpu.dot_dimension_numbers<[1], [0], [0], [1], [0, 0, 1, 1], [], []>} : vector<64x10xf32>, vector<10x128xf32>, vector<64x128xf32> -> vector<64x128xf32>
    %c0_3 = arith.constant 0 : index
    %c0_4 = arith.constant 0 : index
    %3 = vector.load %arg3[%c0_3, %c0_4] : memref<64x1xf32, #tpu.memory_space<vmem>>, vector<64x1xf32>
    %4 = vector.broadcast %3 : vector<64x1xf32> to vector<64x128xf32>
    %5 = arith.addf %2, %4 : vector<64x128xf32>
    %c128_i32 = arith.constant 128 : i32
    %6 = arith.muli %arg0, %c128_i32 : i32
    %7 = tpu.iota {dimensions = array<i32: 1>} : vector<1x128xi32>
    %8 = vector.broadcast %6 : i32 to vector<1x128xi32>
    %9 = arith.addi %8, %7 : vector<1x128xi32>
    %c319_i32 = arith.constant 319 : i32
    %10 = vector.broadcast %c319_i32 : i32 to vector<1x128xi32>
    %11 = arith.cmpi slt, %9, %10 : vector<1x128xi32>
    %cst_5 = arith.constant 0.000000e+00 : f32
    %12 = vector.shape_cast %11 : vector<1x128xi1> to vector<1x128xi1>
    %13 = vector.broadcast %12 : vector<1x128xi1> to vector<64x128xi1>
    %14 = vector.broadcast %cst_5 : f32 to vector<64x128xf32>
    %15 = arith.select %13, %5, %14 : vector<64x128xi1>, vector<64x128xf32>
    %cst_6 = arith.constant dense<0.000000e+00> : vector<64xf32>
    %16 = vector.multi_reduction <add>, %15, %cst_6 [1] : vector<64x128xf32> to vector<64xf32>
    %17 = vector.shape_cast %16 : vector<64xf32> to vector<64x1xf32>
    %c0_7 = arith.constant 0 : index
    %c0_8 = arith.constant 0 : index
    %c0_9 = arith.constant 0 : index
    %18 = vector.load %arg4[%c0_7, %c0_8, %c0_9] : memref<1x64x1xf32, #tpu.memory_space<vmem>>, vector<1x64x1xf32>
    %19 = vector.shape_cast %18 : vector<1x64x1xf32> to vector<64x1xf32>
    %20 = vector.shape_cast %17 : vector<64x1xf32> to vector<1x64x1xf32>
    tpu.vector_store %arg4[%c0_7, %c0_8, %c0_9], %20 {strides = array<i32>} : memref<1x64x1xf32, #tpu.memory_space<vmem>>, vector<1x64x1xf32>,
    %21 = arith.mulf %15, %15 : vector<64x128xf32>
    %cst_10 = arith.constant dense<0.000000e+00> : vector<64xf32>
    %22 = vector.multi_reduction <add>, %21, %cst_10 [1] : vector<64x128xf32> to vector<64xf32>
    %23 = vector.shape_cast %22 : vector<64xf32> to vector<64x1xf32>
    %c0_11 = arith.constant 0 : index
    %c0_12 = arith.constant 0 : index
    %c0_13 = arith.constant 0 : index
    %24 = vector.load %arg5[%c0_11, %c0_12, %c0_13] : memref<1x64x1xf32, #tpu.memory_space<vmem>>, vector<1x64x1xf32>
    %25 = vector.shape_cast %24 : vector<1x64x1xf32> to vector<64x1xf32>
    %26 = vector.shape_cast %23 : vector<64x1xf32> to vector<1x64x1xf32>
    tpu.vector_store %arg5[%c0_11, %c0_12, %c0_13], %26 {strides = array<i32>} : memref<1x64x1xf32, #tpu.memory_space<vmem>>, vector<1x64x1xf32>,
    return
  }
  func.func @transform_0(%arg0: i32) -> (i32, i32) {
    %c0_i32 = arith.constant 0 : i32
    %c0_i32_0 = arith.constant 0 : i32
    return %c0_i32, %arg0 : i32, i32
  }
  func.func @transform_1(%arg0: i32) -> (i32, i32) {
    %c0_i32 = arith.constant 0 : i32
    %c0_i32_0 = arith.constant 0 : i32
    %c0_i32_1 = arith.constant 0 : i32
    return %c0_i32, %c0_i32_0 : i32, i32
  }
  func.func @transform_2(%arg0: i32) -> (i32, i32) {
    %c0_i32 = arith.constant 0 : i32
    %c0_i32_0 = arith.constant 0 : i32
    %c0_i32_1 = arith.constant 0 : i32
    return %c0_i32, %c0_i32_0 : i32, i32
  }
  func.func @transform_3(%arg0: i32) -> (i32, i32, i32) {
    %c0_i32 = arith.constant 0 : i32
    %c0_i32_0 = arith.constant 0 : i32
    %c0_i32_1 = arith.constant 0 : i32
    return %arg0, %c0_i32, %c0_i32_0 : i32, i32, i32
  }
  func.func @transform_4(%arg0: i32) -> (i32, i32, i32) {
    %c0_i32 = arith.constant 0 : i32
    %c0_i32_0 = arith.constant 0 : i32
    %c0_i32_1 = arith.constant 0 : i32
    return %arg0, %c0_i32, %c0_i32_0 : i32, i32, i32
  }
}

</mosaic_0001>

<bundles_post_ra>
// kernel: tpu_custom_call.1
= control target key start
LH: loop header
LB: loop body
LE: loop exit
PB: predicated region body
PF: predicated region fallthrough
CT: control target
= control target key end

     0   :  { %s747_s15 = smov 0   ;;  %s749_s16 = smov 0   ;;  %s875_s0 = inlined_call_operand.vmem [shape: f32[10,384], index: 0, kind: input, shape index: {}]   ;;  %s876_s1 = inlined_call_operand.vmem [shape: f32[64,10], index: 1, kind: input, shape index: {}]   ;;  %s877_s2 = inlined_call_operand.vmem [shape: f32[64,1], index: 2, kind: input, shape index: {}]   ;;  %s878_s3 = inlined_call_operand.vmem [shape: f32[3,64,1], index: 3, kind: output, shape index: {0}]   ;;  %s879_s4 = inlined_call_operand.vmem [shape: f32[3,64,1], index: 4, kind: output, shape index: {1}]  }
   0x1   :  { %s751_s17 = smov 0  }
   0x2 LB: > { %s760_s18 = sadd.s32 4294967295, %s718_s17   ;;  %s762_s19 = sadd.s32 1, %s718_s17   ;;  %s718_s17 = sphi %s751_s17, %s882_s17   ;;  %s714_s16 = sphi %s749_s16, %s881_s16   ;;  %s710_s15 = sphi %s747_s15, %s880_s15  }
   0x3   : > { %s19_s20 = ssub.s32 %s718_s17, %s762_s19  ;;  %s22_s21 = sadd.s32 1, %s714_s16 }
   0x4   : > { %p20_p0 = scmp.eq.s32.totalorder %s19_s20, 0  ;;  %p29_p1 = scmp.ne.s32.totalorder %s714_s16, %s710_s15 }
   0x5   : > { %p30_p2 = scmp.eq.s32.totalorder %s718_s17, 0  ;;  %p611_p4 = scmp.ge.s32.totalorder %s718_s17, 3 }
   0x6   : > { %s769_s22 = scalar_select %p20_p0, %s714_s16, %s22_s21  }
   0x7   : > { %p31_p3 = por %p30_p2, %p29_p1  ;;  %155 = sbr.rel (%p611_p4) target bundleno = 21 (0x15), region = 24 }
   0xe   : > { %158 = sbr.rel (!%p31_p3) target bundleno = 21 (0x15), region = 28  ;;  %s160_s23 = sand.u32 (%p31_p3), 1, %s714_s16  }
   0xf   : > { %s613_s24 = sshll.u32 (%p31_p3), %s718_s17, 3  ;;  %s612_s25 = sshll.u32 (%p31_p3), %s160_s23, 4 }
  0x10   : > { %s164_s28 = scalar_lea.vmem (%p31_p3), %s875_s0, %s613_s24  ;;  %s162_s29 = scalar_lea.vmem (%p31_p3), [#allocation2], %s612_s25 }
  0x11   : > { %v194_v0 = vld [vmem:[%s164_s28] sm:$0xff] (%p31_p3)  ;;  %v196_v1 = vld [vmem:[%s164_s28 + $0x18] sm:$0xff] (%p31_p3) }
  0x12   : > { %195 = vst [vmem:[%s162_s29] sm:$0xff] (%p31_p3), %v194_v0  ;;  %197 = vst [vmem:[%s162_s29 + $0x8] sm:$0xff] (%p31_p3), %v196_v1 }
  0x15 PF: > { %p614_p5 = scmp.ge.s32.totalorder %s718_s17, 1  ;;  %p202_p6 = scmp.lt.s32.totalorder %s718_s17, 4 }
  0x17   : > { %p203_p7 = pnand %p614_p5, %p202_p6 }
  0x18   : > { %s209_s30 = sand.u32 (!%p203_p7), 1, %s710_s15   ;;  %vm332_vm0 = vcmask (!%p203_p7), 1041408   ;;  %v249_v2 = vld [vmem:[%s876_s1] sm:$0xff] (!%p203_p7)  ;;  %vm307_vm1 = vcmask (!%p203_p7), 80896   ;;  %v720_v4 = vmov (!%p203_p7), 0   ;;  %vm721_vm2 = vmmov (!%p203_p7), 1  }
  0x19   : > { %206 = sbr.rel (%p203_p7) target bundleno = 424 (0x1a8), region = 66  ;;  %v253_v3 = vld [vmem:[%s876_s1 + $0x20] sm:$0xff] (!%p203_p7)  ;;  %s615_s9 = sshll.u32 (!%p203_p7), %s209_s30, 4  ;;  %648 = vmatprep.mubr.msk.f32.mxu0 (!%p203_p7), %vm307_vm1, %v249_v2  ;;  %695 = vset.pattern.permute.xlu1 (!%p203_p7), %v720_v4  ;;  %vm661_vm3 = vmpackc.low (!%p203_p7), %vm332_vm0, %vm721_vm2  ;;  %v261_v8 = vld [vmem:[%s877_s2 + $0x10] sm:$0xff] (!%p203_p7)  ;;  %v442_v23 = vlaneseq (!%p203_p7)  ;;  %vm473_vm5 = vcmask (!%p203_p7), 7168  }
  0x1a   : > { %654 = vmatprep.mubr.msk.f32.mxu1 (!%p203_p7), %vm307_vm1, %v253_v3  ;;  %694 = vset.pattern.permute.xlu0 (!%p203_p7), %v720_v4  ;;  %s211_s10 = scalar_lea.vmem (!%p203_p7), [#allocation2], %s615_s9  ;;  %v259_v9 = vld [vmem:[%s877_s2] sm:$0xff] (!%p203_p7)  ;;  %v262_v10 = vld [vmem:[%s877_s2 + $0x18] sm:$0xff] (!%p203_p7)  ;;  %v250_v11 = vld [vmem:[%s876_s1 + $0x8] sm:$0xff] (!%p203_p7)  ;;  %s629_s20 = sshll.u32 (!%p203_p7), %s760_s18, 7 }
  0x1b   : > { %v257_v5 = vld [vmem:[%s211_s10] sm:$0xff] (!%p203_p7)  ;;  %v258_v6 = vld [vmem:[%s211_s10 + $0x8] sm:$0x3] (!%p203_p7)  ;;  %279 = vperm.xlu1 (!%p203_p7), %695, %v261_v8   ;;  %269 = vperm.xlu0 (!%p203_p7), %694, %v259_v9   ;;  %v443_v25 = vand.u32 (!%p203_p7), 127, %v442_v23  ;;  %v444_v27 = vstv (!%p203_p7), %s629_s20  ;;  %p239_p8 = scmp.lt.s32.totalorder (!%p203_p7), %s760_s18, 2 }
  0x1c   : > { %v660_v7 = vpack.c.bf16 (!%p203_p7), %v258_v6, %v257_v5  ;;  %v254_v12 = vld [vmem:[%s876_s1 + $0x28] sm:$0xff] (!%p203_p7)  ;;  %v251_v13 = vld [vmem:[%s876_s1 + $0x10] sm:$0xff] (!%p203_p7)  ;;  %v252_v17 = vld [vmem:[%s876_s1 + $0x18] sm:$0xff] (!%p203_p7) }
  0x1d   : > { %v255_v14 = vld [vmem:[%s876_s1 + $0x30] sm:$0xff] (!%p203_p7)  ;;  %v260_v15 = vld [vmem:[%s877_s2 + $0x8] sm:$0xff] (!%p203_p7)  ;;  %v256_v18 = vld [vmem:[%s876_s1 + $0x38] sm:$0xff] (!%p203_p7)  ;;  %v445_v29 = vadd.s32 (!%p203_p7), %v444_v27, %v443_v25 }
  0x1e   : > { %662 = vmatprep.subr.msk.bf16.mxu0 (!%p203_p7), %vm661_vm3, %v660_v7  ;;  %666 = vmatprep.subr.msk.bf16.mxu1 (!%p203_p7), %vm661_vm3, %v660_v7  ;;  %v264_v16 = vld [vmem:[%s877_s2 + $0x28] sm:$0xff] (!%p203_p7)  ;;  %v263_v19 = vld [vmem:[%s877_s2 + $0x20] sm:$0xff] (!%p203_p7)  ;;  %v266_v20 = vld [vmem:[%s877_s2 + $0x38] sm:$0xff] (!%p203_p7) }
  0x1f   : > { %665 = vmatpush3.bf16.msk.msra.mxu0 (!%p203_p7), %vm661_vm3, %v660_v7  ;;  %667 = vmatpush3.bf16.msk.msra.mxu1 (!%p203_p7), %vm661_vm3, %v660_v7  ;;  %v265_v21 = vld [vmem:[%s877_s2 + $0x30] sm:$0xff] (!%p203_p7)  ;;  %vm446_vm4 = vcmp.lt.s32.totalorder (!%p203_p7), %v445_v29, 319 }
  0x20   : > { %284 = vperm.xlu1 %695, %v262_v10   ;;  %274 = vperm.xlu0 %694, %v260_v15   ;;  %s884_s18 = smov (!%p239_p8, %s760_s18), 2 }
  0x21   : > { %s632_s21 = sshll.u32 %s884_s18, 6 }
  0x22   : > { %649 = vmatmul.mubr.msk.f32.vlgmr.msra.gmra.mrb[0].mxu0 %vm307_vm1, %v250_v11  ;;  %655 = vmatmul.mubr.msk.f32.vlgmr.msra.gmra.mrb[0].mxu1 %vm307_vm1, %v254_v12  ;;  %s243_s25 = scalar_lea.vmem %s878_s3, %s632_s21  ;;  %s248_s18 = scalar_lea.vmem %s879_s4, %s632_s21 }
  0x23   : > { %651 = vmatprep.mubr.msk.f32.mxu0 %vm307_vm1, %v251_v13  ;;  %657 = vmatprep.mubr.msk.f32.mxu1 %vm307_vm1, %v255_v14 }
  0x24   : > { %294 = vperm.xlu1 %695, %v264_v16   ;;  %289 = vperm.xlu0 %694, %v263_v19  }
  0x26   : > { %652 = vmatmul.mubr.msk.f32.gmra.mrb[2].mxu0 %vm307_vm1, %v252_v17  ;;  %658 = vmatmul.mubr.msk.f32.gmra.mrb[2].mxu1 %vm307_vm1, %v256_v18 }
  0x28   : > { %304 = vperm.xlu1 %695, %v266_v20   ;;  %299 = vperm.xlu0 %694, %v265_v21  }
  0x9a   : > { %v280_v22 = vpop.permute.xlu1 %279  ;;  %v270_v24 = vpop.permute.xlu0 %269 }
  0x9f   : > { %v285_v26 = vpop.permute.xlu1 %284  ;;  %v275_v28 = vpop.permute.xlu0 %274 }
  0xa3   : > { %v295_v30 = vpop.permute.xlu1 %294  ;;  %v290_v37 = vpop.permute.xlu0 %289 }
  0xa7   : > { %v300_v50 = vpop.permute.xlu0 %299  ;;  %v305_v56 = vpop.permute.xlu1 %304 }
  0xf5   : > { %v650_v31 = vpop.f32.mrb[0].mxu0  ;;  %v656_v32 = vpop.f32.mrb[0].mxu1 }
  0xf6   : > { %v408_v33 = vadd.f32 %v650_v31, %v275_v28  ;;  %v428_v34 = vadd.f32 %v656_v32, %v295_v30  ;;  %v422_v35 = vpop.f32.mrb[1].mxu1  ;;  %v402_v36 = vpop.f32.mrb[1].mxu0 }
  0xf7   : > { %v423_v38 = vadd.f32 %v422_v35, %v290_v37  ;;  %v403_v39 = vadd.f32 %v402_v36, %v270_v24 }
  0xf8   : > { %v454_v40 = vsel %vm446_vm4, %v428_v34, 0.0  ;;  %v450_v41 = vsel %vm446_vm4, %v408_v33, 0.0 }
  0xf9   : > { %467 = vadd.xlane.f32.xlu0 %v454_v40  ;;  %v659_v42 = vpop.f32.mrb[2].mxu1  ;;  %459 = vadd.xlane.f32.xlu1 %v450_v41  ;;  %v653_v43 = vpop.f32.mrb[2].mxu0  ;;  %v453_v46 = vsel %vm446_vm4, %v423_v38, 0.0  ;;  %v449_v47 = vsel %vm446_vm4, %v403_v39, 0.0  ;;  %v483_v48 = vmul.f32 %v450_v41, %v450_v41  ;;  %v487_v51 = vmul.f32 %v454_v40, %v454_v40 }
  0xfa   : > { %v412_v44 = vpop.f32.mrb[3].mxu0  ;;  %v432_v45 = vpop.f32.mrb[3].mxu1  ;;  %v482_v49 = vmul.f32 %v449_v47, %v449_v47  ;;  %v486_v52 = vmul.f32 %v453_v46, %v453_v46  ;;  %v418_v53 = vadd.f32 %v653_v43, %v285_v26  ;;  %v438_v57 = vadd.f32 %v659_v42, %v305_v56 }
  0xfb   : > { %v413_v54 = vadd.f32 %v412_v44, %v280_v22  ;;  %v433_v55 = vadd.f32 %v432_v45, %v300_v50 }
  0xfc   : > { %v452_v58 = vsel %vm446_vm4, %v418_v53, 0.0  ;;  %v456_v62 = vsel %vm446_vm4, %v438_v57, 0.0 }
  0xfd   : > { %465 = vadd.xlane.f32.xlu1 %v453_v46  ;;  %457 = vadd.xlane.f32.xlu0 %v449_v47  ;;  %v455_v59 = vsel %vm446_vm4, %v433_v55, 0.0  ;;  %v451_v60 = vsel %vm446_vm4, %v413_v54, 0.0  ;;  %v485_v0 = vmul.f32 %v452_v58, %v452_v58  ;;  %v489_v1 = vmul.f32 %v456_v62, %v456_v62 }
  0xfe   : > { %v484_v61 = vmul.f32 %v451_v60, %v451_v60  ;;  %v488_v63 = vmul.f32 %v455_v59, %v455_v59 }
 0x101   : > { %492 = vadd.xlane.f32.xlu0 %v483_v48  ;;  %490 = vadd.xlane.f32.xlu1 %v482_v49 }
 0x105   : > { %500 = vadd.xlane.f32.xlu0 %v487_v51  ;;  %498 = vadd.xlane.f32.xlu1 %v486_v52 }
 0x109   : > { %463 = vadd.xlane.f32.xlu0 %v452_v58  ;;  %469 = vadd.xlane.f32.xlu1 %v455_v59 }
 0x10d   : > { %471 = vadd.xlane.f32.xlu0 %v456_v62  ;;  %494 = vadd.xlane.f32.xlu1 %v484_v61 }
 0x111   : > { %461 = vadd.xlane.f32.xlu0 %v451_v60  ;;  %502 = vadd.xlane.f32.xlu1 %v488_v63 }
 0x115   : > { %496 = vadd.xlane.f32.xlu0 %v485_v0 }
 0x119   : > { %504 = vadd.xlane.f32.xlu0 %v489_v1 }
 0x186   : > { %v468_v2 = vpop.xlane.xlu0 %467  ;;  %v460_v3 = vpop.xlane.xlu1 %459 }
 0x187   : > { %479 = vst.msk [vmem:[%s243_s25 + $0x28] sm:$0xff] %vm473_vm5, %v468_v2  ;;  %475 = vst.msk [vmem:[%s243_s25 + $0x8] sm:$0xff] %vm473_vm5, %v460_v3 }
 0x18a   : > { %v466_v4 = vpop.xlane.xlu1 %465  ;;  %v458_v5 = vpop.xlane.xlu0 %457 }
 0x18b   : > { %478 = vst.msk [vmem:[%s243_s25 + $0x20] sm:$0xff] %vm473_vm5, %v466_v4  ;;  %474 = vst.msk [vmem:[%s243_s25] sm:$0xff] %vm473_vm5, %v458_v5 }
 0x18e   : > { %v493_v6 = vpop.xlane.xlu0 %492  ;;  %v491_v7 = vpop.xlane.xlu1 %490 }
 0x18f   : > { %507 = vst.msk [vmem:[%s248_s18 + $0x8] sm:$0xff] %vm473_vm5, %v493_v6  ;;  %506 = vst.msk [vmem:[%s248_s18] sm:$0xff] %vm473_vm5, %v491_v7 }
 0x192   : > { %v501_v8 = vpop.xlane.xlu0 %500  ;;  %v499_v9 = vpop.xlane.xlu1 %498 }
 0x193   : > { %511 = vst.msk [vmem:[%s248_s18 + $0x28] sm:$0xff] %vm473_vm5, %v501_v8  ;;  %510 = vst.msk [vmem:[%s248_s18 + $0x20] sm:$0xff] %vm473_vm5, %v499_v9 }
 0x196   : > { %v464_v10 = vpop.xlane.xlu0 %463  ;;  %v470_v11 = vpop.xlane.xlu1 %469 }
 0x197   : > { %477 = vst.msk [vmem:[%s243_s25 + $0x18] sm:$0xff] %vm473_vm5, %v464_v10  ;;  %480 = vst.msk [vmem:[%s243_s25 + $0x30] sm:$0xff] %vm473_vm5, %v470_v11 }
 0x19a   : > { %v472_v12 = vpop.xlane.xlu0 %471  ;;  %v495_v13 = vpop.xlane.xlu1 %494 }
 0x19b   : > { %481 = vst.msk [vmem:[%s243_s25 + $0x38] sm:$0xff] %vm473_vm5, %v472_v12  ;;  %508 = vst.msk [vmem:[%s248_s18 + $0x10] sm:$0xff] %vm473_vm5, %v495_v13 }
 0x19e   : > { %v462_v14 = vpop.xlane.xlu0 %461  ;;  %v503_v15 = vpop.xlane.xlu1 %502 }
 0x19f   : > { %476 = vst.msk [vmem:[%s243_s25 + $0x10] sm:$0xff] %vm473_vm5, %v462_v14  ;;  %512 = vst.msk [vmem:[%s248_s18 + $0x30] sm:$0xff] %vm473_vm5, %v503_v15 }
 0x1a2   : > { %v497_v16 = vpop.xlane.xlu0 %496 }
 0x1a3   : > { %509 = vst.msk [vmem:[%s248_s18 + $0x18] sm:$0xff] %vm473_vm5, %v497_v16 }
 0x1a6   : > { %v505_v17 = vpop.xlane.xlu0 %504 }
 0x1a7   : > { %513 = vst.msk [vmem:[%s248_s18 + $0x38] sm:$0xff] %vm473_vm5, %v505_v17 }
 0x1a8 PF: > { %p12_p9 = scmp.ge.s32.totalorder %s762_s19, 5   ;;  %s880_s15 = smov %s714_s16 }
 0x1a9   : > { %s881_s16 = smov %s769_s22  ;;  %s882_s17 = smov %s762_s19 }
 0x1aa   :  { %14 = sbr.rel (!%p12_p9) target bundleno = 2 (0x2), region = 117 }

</bundles_post_ra>
